<compile_context>
chip_gen: v7x
topology: tpu7x:2x2x1
jax: 0.10.0
libtpu: 0.0.40
codegen_flags: <defaults>
</compile_context>

<pallas_src>
import functools

import jax
import jax.numpy as jnp
from jax.experimental import pallas as pl
from jax.experimental.pallas import tpu as pltpu


def basic_block_kernel(x_ref, w1_ref, b1_ref, w2_ref, b2_ref, mask_ref, o_ref,
                       stack_ref, *, H, W, compute_dtype, stack_taps):
    """One image per grid step, channels-major layout.

    x_ref    : (1, Cin, H*W)      f32    -- channels on sublanes, spatial on lanes
    w1_ref   : (Cmid, Cin)        compute_dtype (BN1 scale folded in)
    b1_ref   : (Cmid, 1)          f32
    w2_ref   : (Cout, 9*Cmid)     compute_dtype (BN2 scale folded in,
                                   contraction index = tap*Cmid + c, tap = ky*3+kx)
    b2_ref   : (Cout, 1)          f32
    mask_ref : (9, H*W)           compute_dtype  -- 0/1 boundary masks per tap
    o_ref    : (1, Cout, H*W)     f32
    stack_ref: (9*Cmid, H*W)      compute_dtype  VMEM scratch (tap-stacked acts)
    """
    HW = H * W
    Cmid = w1_ref.shape[0]
    Cout = w2_ref.shape[0]

    # ---- conv1 (1x1) == channels-major matmul on the MXU ----
    h = jnp.dot(w1_ref[...], x_ref[0].astype(compute_dtype),
                preferred_element_type=jnp.float32)           # (Cmid, HW) f32
    h = h + b1_ref[...]                                       # BN1 bias
    h = jnp.maximum(h, 0.1 * h)                               # LeakyReLU(0.1)
    h_c = h.astype(compute_dtype)                             # single cast

    masks = mask_ref[...]                                     # (9, HW)

    def shifted_tap(dy, dx):
        tap = (dy + 1) * 3 + (dx + 1)
        shift = dy * W + dx                                   # source offset
        if shift == 0:
            return tap, h_c                                   # center: mask == 1
        # g[p] = h[p + shift]  (cyclic; wrap positions zeroed by the mask)
        g = pltpu.roll(h_c, (-shift) % HW, axis=1)
        return tap, g * masks[tap:tap + 1, :]

    if stack_taps:
        # Stack the 9 taps along the contraction axis -> one K=9*Cmid MXU dot.
        for dy in (-1, 0, 1):
            for dx in (-1, 0, 1):
                tap, g = shifted_tap(dy, dx)
                stack_ref[pl.ds(tap * Cmid, Cmid), :] = g
        acc = jnp.dot(w2_ref[...], stack_ref[...],
                      preferred_element_type=jnp.float32)     # (Cout, HW) f32
    else:
        # v5e-friendly fallback: 9 small dots accumulated in f32 (no staging
        # stores competing for the single vst slot).
        acc = jnp.zeros((Cout, HW), jnp.float32)
        for dy in (-1, 0, 1):
            for dx in (-1, 0, 1):
                tap, g = shifted_tap(dy, dx)
                acc = acc + jnp.dot(w2_ref[:, tap * Cmid:(tap + 1) * Cmid], g,
                                    preferred_element_type=jnp.float32)

    acc = acc + b2_ref[...]                                   # BN2 bias
    acc = jnp.maximum(acc, 0.1 * acc)                         # LeakyReLU(0.1)
    # Residual re-read from VMEM here (bounds its live range across the taps).
    o_ref[0] = (acc + x_ref[0].astype(jnp.float32)).astype(o_ref.dtype)


def _fold_bn_into_weights(params, eps, compute_dtype):
    """Fold inference-mode BN scale into the conv weights; keep bias separate."""
    (w1, g1, be1, m1, v1, w2, g2, be2, m2, v2) = params
    Cmid, Cin = w1.shape[0], w1.shape[1]
    Cout = w2.shape[0]
    inv1 = g1 * jax.lax.rsqrt(v1 + eps)                       # (Cmid,)
    inv2 = g2 * jax.lax.rsqrt(v2 + eps)                       # (Cout,)
    w1f = (w1.reshape(Cmid, Cin) * inv1[:, None]).astype(compute_dtype)
    b1f = (be1 - m1 * inv1).reshape(Cmid, 1).astype(jnp.float32)
    # (Cout, Cmid, 3, 3) -> (Cout, ky, kx, Cmid) -> (Cout, 9*Cmid);
    # contraction index = tap*Cmid + c with tap = ky*3 + kx.
    w2f = jnp.transpose(w2, (0, 2, 3, 1)).reshape(Cout, 9 * Cmid)
    w2f = (w2f * inv2[:, None]).astype(compute_dtype)
    b2f = (be2 - m2 * inv2).reshape(Cout, 1).astype(jnp.float32)
    return w1f, b1f, w2f, b2f


def _make_tap_masks(H, W, compute_dtype):
    """(9, H*W) 0/1 masks: mask[tap, p] == 1 iff the shifted source pixel is
    inside the image (zero-padding semantics of pad=1)."""
    row_id = jnp.repeat(jnp.arange(H, dtype=jnp.int32), W)    # (HW,)
    col_id = jnp.tile(jnp.arange(W, dtype=jnp.int32), H)      # (HW,)
    masks = []
    for dy in (-1, 0, 1):
        for dx in (-1, 0, 1):
            ok = jnp.ones((H * W,), jnp.bool_)
            if dy == -1:
                ok = ok & (row_id >= 1)
            if dy == 1:
                ok = ok & (row_id <= H - 2)
            if dx == -1:
                ok = ok & (col_id >= 1)
            if dx == 1:
                ok = ok & (col_id <= W - 2)
            masks.append(ok)
    return jnp.stack(masks, axis=0).astype(compute_dtype)     # (9, HW)


def basic_block(x_nchw, params, eps=1e-5, compute_dtype=jnp.bfloat16,
                stack_taps=True):
    """NCHW in / NCHW out, matching BasicBlock.forward in eval() mode."""
    N, Cin, H, W = x_nchw.shape
    HW = H * W
    w1f, b1f, w2f, b2f = _fold_bn_into_weights(params, eps, compute_dtype)
    Cmid = w1f.shape[0]
    Cout = w2f.shape[0]
    assert Cout == Cin, "residual add requires planes[1] == inplanes"

    masks = _make_tap_masks(H, W, compute_dtype)               # (9, HW)
    x2 = x_nchw.reshape(N, Cin, HW)                            # free reshape

    # Scoped-VMEM budget: double-buffered I/O blocks + weights + masks +
    # tap-stack scratch + live f32 temporaries.  Cap below v7x's 64 MiB/TC.
    itemsize = jnp.dtype(compute_dtype).itemsize
    block_bytes = (2 * (Cin + Cout) * HW * 4
                   + (Cmid * Cin + Cout * 9 * Cmid) * itemsize
                   + 9 * HW * itemsize
                   + 9 * Cmid * HW * itemsize
                   + 4 * max(Cmid, Cout) * HW * 4)
    vmem_limit = int(min(56 * 1024 * 1024,
                         max(32 * 1024 * 1024, 2 * block_bytes)))

    kernel = functools.partial(basic_block_kernel, H=H, W=W,
                               compute_dtype=compute_dtype,
                               stack_taps=stack_taps)
    out = pl.pallas_call(
        kernel,
        out_shape=jax.ShapeDtypeStruct((N, Cout, HW), x_nchw.dtype),
        grid_spec=pltpu.PrefetchScalarGridSpec(
            num_scalar_prefetch=0,
            grid=(N,),
            in_specs=[
                pl.BlockSpec((1, Cin, HW), lambda n: (n, 0, 0)),
                pl.BlockSpec((Cmid, Cin), lambda n: (0, 0)),
                pl.BlockSpec((Cmid, 1), lambda n: (0, 0)),
                pl.BlockSpec((Cout, 9 * Cmid), lambda n: (0, 0)),
                pl.BlockSpec((Cout, 1), lambda n: (0, 0)),
                pl.BlockSpec((9, HW), lambda n: (0, 0)),
            ],
            out_specs=pl.BlockSpec((1, Cout, HW), lambda n: (n, 0, 0)),
            scratch_shapes=[pltpu.VMEM((9 * Cmid, HW), compute_dtype)],
        ),
        compiler_params=pltpu.CompilerParams(
            dimension_semantics=("parallel",),
            vmem_limit_bytes=vmem_limit),
    )(x2, w1f, b1f, w2f, b2f, masks)
    return out.reshape(N, Cout, H, W)


def basic_block_ref(x, params, eps=1e-5):
    """Pure-JAX (XLA conv) reference, NCHW, eval-mode BN."""
    (w1, g1, be1, m1, v1, w2, g2, be2, m2, v2) = params
    dn = ('NCHW', 'OIHW', 'NCHW')
    hp = jax.lax.Precision.HIGHEST

    def bn(y, g, b, m, v):
        s = g * jax.lax.rsqrt(v + eps)
        return y * s[None, :, None, None] + (b - m * s)[None, :, None, None]

    h = jax.lax.conv_general_dilated(x, w1, (1, 1), 'SAME',
                                     dimension_numbers=dn, precision=hp)
    h = bn(h, g1, be1, m1, v1)
    h = jnp.where(h >= 0, h, 0.1 * h)
    o = jax.lax.conv_general_dilated(h, w2, (1, 1), 'SAME',
                                     dimension_numbers=dn, precision=hp)
    o = bn(o, g2, be2, m2, v2)
    o = jnp.where(o >= 0, o, 0.1 * o)
    return o + x


if __name__ == "__main__":
    # inplanes=8, planes=(4, 8), batch=2, spatial=16x16 (planes[1] == inplanes).
    N, Cin, H, W = 2, 8, 16, 16
    Cmid, Cout = 4, Cin

    key = jax.random.PRNGKey(0)
    ks = jax.random.split(key, 11)

    # PyTorch-convention parameter shapes (deterministic synthetic values).
    w1 = 0.2 * jax.random.normal(ks[0], (Cmid, Cin, 1, 1), jnp.float32)   # conv1.weight
    g1 = 1.0 + 0.1 * jax.random.normal(ks[1], (Cmid,), jnp.float32)       # bn1.weight
    be1 = 0.1 * jax.random.normal(ks[2], (Cmid,), jnp.float32)            # bn1.bias
    m1 = 0.1 * jax.random.normal(ks[3], (Cmid,), jnp.float32)             # bn1.running_mean
    v1 = jnp.abs(jax.random.normal(ks[4], (Cmid,), jnp.float32)) + 0.5    # bn1.running_var
    w2 = 0.2 * jax.random.normal(ks[5], (Cout, Cmid, 3, 3), jnp.float32)  # conv2.weight
    g2 = 1.0 + 0.1 * jax.random.normal(ks[6], (Cout,), jnp.float32)
    be2 = 0.1 * jax.random.normal(ks[7], (Cout,), jnp.float32)
    m2 = 0.1 * jax.random.normal(ks[8], (Cout,), jnp.float32)
    v2 = jnp.abs(jax.random.normal(ks[9], (Cout,), jnp.float32)) + 0.5
    params = (w1, g1, be1, m1, v1, w2, g2, be2, m2, v2)

    x = jax.random.normal(ks[10], (N, Cin, H, W), jnp.float32)

    ref = jax.block_until_ready(basic_block_ref(x, params))

    # f32 MXU path (validation / v5e-strict): tight check vs the XLA reference.
    out_f32 = jax.block_until_ready(
        jax.jit(functools.partial(basic_block, compute_dtype=jnp.float32))(x, params))
    if out_f32.shape != ref.shape or not jnp.allclose(out_f32, ref, atol=1e-2, rtol=1e-2):
        raise AssertionError(
            f"f32 path mismatch: max abs diff = {jnp.max(jnp.abs(out_f32 - ref))}")

    # bf16 MXU path (default, stacked single-dot conv2): f32 accumulation.
    out_bf16 = jax.block_until_ready(
        jax.jit(functools.partial(basic_block, compute_dtype=jnp.bfloat16))(x, params))
    if not jnp.allclose(out_bf16, ref, atol=5e-2, rtol=5e-2):
        raise AssertionError(
            f"bf16 path mismatch: max abs diff = {jnp.max(jnp.abs(out_bf16 - ref))}")

    # bf16, 9-dot fallback (v5e alternative where staging stores may bind).
    out_9dot = jax.block_until_ready(
        jax.jit(functools.partial(basic_block, compute_dtype=jnp.bfloat16,
                                  stack_taps=False))(x, params))
    if not jnp.allclose(out_9dot, ref, atol=5e-2, rtol=5e-2):
        raise AssertionError(
            f"9-dot path mismatch: max abs diff = {jnp.max(jnp.abs(out_9dot - ref))}")

    print("KERNEL_OK")
</pallas_src>

<mosaic_0001>
module attributes {stable_mosaic.version = 11 : i64} {
  func.func @basic_block_kernel(%arg0: i32, %arg1: memref<1x8x256xf32, #tpu.memory_space<vmem>>, %arg2: memref<4x8xf32, #tpu.memory_space<vmem>>, %arg3: memref<4x1xf32, #tpu.memory_space<vmem>>, %arg4: memref<8x36xf32, #tpu.memory_space<vmem>>, %arg5: memref<8x1xf32, #tpu.memory_space<vmem>>, %arg6: memref<9x256xf32, #tpu.memory_space<vmem>>, %arg7: memref<1x8x256xf32, #tpu.memory_space<vmem>>, %arg8: memref<36x256xf32, #tpu.memory_space<vmem>>) attributes {dimension_semantics = [#tpu.dimension_semantics<parallel>], iteration_bounds = array<i64: 2>, scalar_prefetch = 0 : i64, scratch_operands = 1 : i64, tpu.core_type = #tpu.core_type<tc>, window_params = [{transform_indices = @transform_0, window_bounds = array<i64: 1, 8, 256>}, {pipeline_mode = #tpu.pipeline_mode<synchronous>, transform_indices = @transform_1, window_bounds = array<i64: 4, 8>}, {pipeline_mode = #tpu.pipeline_mode<synchronous>, transform_indices = @transform_2, window_bounds = array<i64: 4, 1>}, {pipeline_mode = #tpu.pipeline_mode<synchronous>, transform_indices = @transform_3, window_bounds = array<i64: 8, 36>}, {pipeline_mode = #tpu.pipeline_mode<synchronous>, transform_indices = @transform_4, window_bounds = array<i64: 8, 1>}, {pipeline_mode = #tpu.pipeline_mode<synchronous>, transform_indices = @transform_5, window_bounds = array<i64: 9, 256>}, {transform_indices = @transform_6, window_bounds = array<i64: 1, 8, 256>}]} {
    %c0 = arith.constant 0 : index
    %c0_0 = arith.constant 0 : index
    %0 = vector.load %arg2[%c0, %c0_0] : memref<4x8xf32, #tpu.memory_space<vmem>>, vector<4x8xf32>
    %c0_1 = arith.constant 0 : index
    %c0_2 = arith.constant 0 : index
    %c0_3 = arith.constant 0 : index
    %1 = vector.load %arg1[%c0_1, %c0_2, %c0_3] : memref<1x8x256xf32, #tpu.memory_space<vmem>>, vector<1x8x256xf32>
    %2 = vector.shape_cast %1 : vector<1x8x256xf32> to vector<8x256xf32>
    %cst = arith.constant dense<0.000000e+00> : vector<4x256xf32>
    %3 = tpu.matmul %0, %2, %cst {dimension_numbers = #tpu.dot_dimension_numbers<[1], [0], [0], [1], [0, 0, 1, 1], [], []>} : vector<4x8xf32>, vector<8x256xf32>, vector<4x256xf32> -> vector<4x256xf32>
    %c0_4 = arith.constant 0 : index
    %c0_5 = arith.constant 0 : index
    %4 = vector.load %arg3[%c0_4, %c0_5] : memref<4x1xf32, #tpu.memory_space<vmem>>, vector<4x1xf32>
    %5 = vector.broadcast %4 : vector<4x1xf32> to vector<4x256xf32>
    %6 = arith.addf %3, %5 : vector<4x256xf32>
    %cst_6 = arith.constant 1.000000e-01 : f32
    %7 = vector.broadcast %cst_6 : f32 to vector<4x256xf32>
    %8 = arith.mulf %7, %6 : vector<4x256xf32>
    %9 = arith.maximumf %6, %8 : vector<4x256xf32>
    %c0_7 = arith.constant 0 : index
    %c0_8 = arith.constant 0 : index
    %10 = vector.load %arg6[%c0_7, %c0_8] : memref<9x256xf32, #tpu.memory_space<vmem>>, vector<9x256xf32>
    %c17_i32 = arith.constant 17 : i32
    %11 = tpu.dynamic_rotate %9 by %c17_i32 dim 1 : vector<4x256xf32>, i32 -> vector<4x256xf32>
    %12 = vector.extract_strided_slice %10 {offsets = [0, 0], sizes = [1, 256], strides = [1, 1]} : vector<9x256xf32> to vector<1x256xf32>
    %13 = vector.broadcast %12 : vector<1x256xf32> to vector<4x256xf32>
    %14 = arith.mulf %11, %13 : vector<4x256xf32>
    %c0_9 = arith.constant 0 : index
    %c0_10 = arith.constant 0 : index
    %15 = vector.load %arg8[%c0_9, %c0_10] : memref<36x256xf32, #tpu.memory_space<vmem>>, vector<4x256xf32>
    tpu.vector_store %arg8[%c0_9, %c0_10], %14 {strides = array<i32>} : memref<36x256xf32, #tpu.memory_space<vmem>>, vector<4x256xf32>,
    %c16_i32 = arith.constant 16 : i32
    %16 = tpu.dynamic_rotate %9 by %c16_i32 dim 1 : vector<4x256xf32>, i32 -> vector<4x256xf32>
    %17 = vector.extract_strided_slice %10 {offsets = [1, 0], sizes = [1, 256], strides = [1, 1]} : vector<9x256xf32> to vector<1x256xf32>
    %18 = vector.broadcast %17 : vector<1x256xf32> to vector<4x256xf32>
    %19 = arith.mulf %16, %18 : vector<4x256xf32>
    %c4 = arith.constant 4 : index
    %c0_11 = arith.constant 0 : index
    %20 = vector.load %arg8[%c4, %c0_11] : memref<36x256xf32, #tpu.memory_space<vmem>>, vector<4x256xf32>
    tpu.vector_store %arg8[%c4, %c0_11], %19 {strides = array<i32>} : memref<36x256xf32, #tpu.memory_space<vmem>>, vector<4x256xf32>,
    %c15_i32 = arith.constant 15 : i32
    %21 = tpu.dynamic_rotate %9 by %c15_i32 dim 1 : vector<4x256xf32>, i32 -> vector<4x256xf32>
    %22 = vector.extract_strided_slice %10 {offsets = [2, 0], sizes = [1, 256], strides = [1, 1]} : vector<9x256xf32> to vector<1x256xf32>
    %23 = vector.broadcast %22 : vector<1x256xf32> to vector<4x256xf32>
    %24 = arith.mulf %21, %23 : vector<4x256xf32>
    %c8 = arith.constant 8 : index
    %c0_12 = arith.constant 0 : index
    %25 = vector.load %arg8[%c8, %c0_12] : memref<36x256xf32, #tpu.memory_space<vmem>>, vector<4x256xf32>
    tpu.vector_store %arg8[%c8, %c0_12], %24 {strides = array<i32>} : memref<36x256xf32, #tpu.memory_space<vmem>>, vector<4x256xf32>,
    %c1_i32 = arith.constant 1 : i32
    %26 = tpu.dynamic_rotate %9 by %c1_i32 dim 1 : vector<4x256xf32>, i32 -> vector<4x256xf32>
    %27 = vector.extract_strided_slice %10 {offsets = [3, 0], sizes = [1, 256], strides = [1, 1]} : vector<9x256xf32> to vector<1x256xf32>
    %28 = vector.broadcast %27 : vector<1x256xf32> to vector<4x256xf32>
    %29 = arith.mulf %26, %28 : vector<4x256xf32>
    %c12 = arith.constant 12 : index
    %c0_13 = arith.constant 0 : index
    %30 = vector.load %arg8[%c12, %c0_13] : memref<36x256xf32, #tpu.memory_space<vmem>>, vector<4x256xf32>
    tpu.vector_store %arg8[%c12, %c0_13], %29 {strides = array<i32>} : memref<36x256xf32, #tpu.memory_space<vmem>>, vector<4x256xf32>,
    %c16 = arith.constant 16 : index
    %c0_14 = arith.constant 0 : index
    %31 = vector.load %arg8[%c16, %c0_14] : memref<36x256xf32, #tpu.memory_space<vmem>>, vector<4x256xf32>
    tpu.vector_store %arg8[%c16, %c0_14], %9 {strides = array<i32>} : memref<36x256xf32, #tpu.memory_space<vmem>>, vector<4x256xf32>,
    %c255_i32 = arith.constant 255 : i32
    %32 = tpu.dynamic_rotate %9 by %c255_i32 dim 1 : vector<4x256xf32>, i32 -> vector<4x256xf32>
    %33 = vector.extract_strided_slice %10 {offsets = [5, 0], sizes = [1, 256], strides = [1, 1]} : vector<9x256xf32> to vector<1x256xf32>
    %34 = vector.broadcast %33 : vector<1x256xf32> to vector<4x256xf32>
    %35 = arith.mulf %32, %34 : vector<4x256xf32>
    %c20 = arith.constant 20 : index
    %c0_15 = arith.constant 0 : index
    %36 = vector.load %arg8[%c20, %c0_15] : memref<36x256xf32, #tpu.memory_space<vmem>>, vector<4x256xf32>
    tpu.vector_store %arg8[%c20, %c0_15], %35 {strides = array<i32>} : memref<36x256xf32, #tpu.memory_space<vmem>>, vector<4x256xf32>,
    %c241_i32 = arith.constant 241 : i32
    %37 = tpu.dynamic_rotate %9 by %c241_i32 dim 1 : vector<4x256xf32>, i32 -> vector<4x256xf32>
    %38 = vector.extract_strided_slice %10 {offsets = [6, 0], sizes = [1, 256], strides = [1, 1]} : vector<9x256xf32> to vector<1x256xf32>
    %39 = vector.broadcast %38 : vector<1x256xf32> to vector<4x256xf32>
    %40 = arith.mulf %37, %39 : vector<4x256xf32>
    %c24 = arith.constant 24 : index
    %c0_16 = arith.constant 0 : index
    %41 = vector.load %arg8[%c24, %c0_16] : memref<36x256xf32, #tpu.memory_space<vmem>>, vector<4x256xf32>
    tpu.vector_store %arg8[%c24, %c0_16], %40 {strides = array<i32>} : memref<36x256xf32, #tpu.memory_space<vmem>>, vector<4x256xf32>,
    %c240_i32 = arith.constant 240 : i32
    %42 = tpu.dynamic_rotate %9 by %c240_i32 dim 1 : vector<4x256xf32>, i32 -> vector<4x256xf32>
    %43 = vector.extract_strided_slice %10 {offsets = [7, 0], sizes = [1, 256], strides = [1, 1]} : vector<9x256xf32> to vector<1x256xf32>
    %44 = vector.broadcast %43 : vector<1x256xf32> to vector<4x256xf32>
    %45 = arith.mulf %42, %44 : vector<4x256xf32>
    %c28 = arith.constant 28 : index
    %c0_17 = arith.constant 0 : index
    %46 = vector.load %arg8[%c28, %c0_17] : memref<36x256xf32, #tpu.memory_space<vmem>>, vector<4x256xf32>
    tpu.vector_store %arg8[%c28, %c0_17], %45 {strides = array<i32>} : memref<36x256xf32, #tpu.memory_space<vmem>>, vector<4x256xf32>,
    %c239_i32 = arith.constant 239 : i32
    %47 = tpu.dynamic_rotate %9 by %c239_i32 dim 1 : vector<4x256xf32>, i32 -> vector<4x256xf32>
    %48 = vector.extract_strided_slice %10 {offsets = [8, 0], sizes = [1, 256], strides = [1, 1]} : vector<9x256xf32> to vector<1x256xf32>
    %49 = vector.broadcast %48 : vector<1x256xf32> to vector<4x256xf32>
    %50 = arith.mulf %47, %49 : vector<4x256xf32>
    %c32 = arith.constant 32 : index
    %c0_18 = arith.constant 0 : index
    %51 = vector.load %arg8[%c32, %c0_18] : memref<36x256xf32, #tpu.memory_space<vmem>>, vector<4x256xf32>
    tpu.vector_store %arg8[%c32, %c0_18], %50 {strides = array<i32>} : memref<36x256xf32, #tpu.memory_space<vmem>>, vector<4x256xf32>,
    %c0_19 = arith.constant 0 : index
    %c0_20 = arith.constant 0 : index
    %52 = vector.load %arg4[%c0_19, %c0_20] : memref<8x36xf32, #tpu.memory_space<vmem>>, vector<8x36xf32>
    %c0_21 = arith.constant 0 : index
    %c0_22 = arith.constant 0 : index
    %53 = vector.load %arg8[%c0_21, %c0_22] : memref<36x256xf32, #tpu.memory_space<vmem>>, vector<36x256xf32>
    %cst_23 = arith.constant dense<0.000000e+00> : vector<8x256xf32>
    %54 = tpu.matmul %52, %53, %cst_23 {dimension_numbers = #tpu.dot_dimension_numbers<[1], [0], [0], [1], [0, 0, 1, 1], [], []>} : vector<8x36xf32>, vector<36x256xf32>, vector<8x256xf32> -> vector<8x256xf32>
    %c0_24 = arith.constant 0 : index
    %c0_25 = arith.constant 0 : index
    %55 = vector.load %arg5[%c0_24, %c0_25] : memref<8x1xf32, #tpu.memory_space<vmem>>, vector<8x1xf32>
    %56 = vector.broadcast %55 : vector<8x1xf32> to vector<8x256xf32>
    %57 = arith.addf %54, %56 : vector<8x256xf32>
    %cst_26 = arith.constant 1.000000e-01 : f32
    %58 = vector.broadcast %cst_26 : f32 to vector<8x256xf32>
    %59 = arith.mulf %58, %57 : vector<8x256xf32>
    %60 = arith.maximumf %57, %59 : vector<8x256xf32>
    %c0_27 = arith.constant 0 : index
    %c0_28 = arith.constant 0 : index
    %c0_29 = arith.constant 0 : index
    %61 = vector.load %arg1[%c0_27, %c0_28, %c0_29] : memref<1x8x256xf32, #tpu.memory_space<vmem>>, vector<1x8x256xf32>
    %62 = vector.shape_cast %61 : vector<1x8x256xf32> to vector<8x256xf32>
    %63 = arith.addf %60, %62 : vector<8x256xf32>
    %c0_30 = arith.constant 0 : index
    %c0_31 = arith.constant 0 : index
    %c0_32 = arith.constant 0 : index
    %64 = vector.load %arg7[%c0_30, %c0_31, %c0_32] : memref<1x8x256xf32, #tpu.memory_space<vmem>>, vector<1x8x256xf32>
    %65 = vector.shape_cast %64 : vector<1x8x256xf32> to vector<8x256xf32>
    %66 = vector.shape_cast %63 : vector<8x256xf32> to vector<1x8x256xf32>
    tpu.vector_store %arg7[%c0_30, %c0_31, %c0_32], %66 {strides = array<i32>} : memref<1x8x256xf32, #tpu.memory_space<vmem>>, vector<1x8x256xf32>,
    return
  }
  func.func @transform_0(%arg0: i32) -> (i32, i32, i32) {
    %c0_i32 = arith.constant 0 : i32
    %c0_i32_0 = arith.constant 0 : i32
    %c0_i32_1 = arith.constant 0 : i32
    return %arg0, %c0_i32, %c0_i32_0 : i32, i32, i32
  }
  func.func @transform_1(%arg0: i32) -> (i32, i32) {
    %c0_i32 = arith.constant 0 : i32
    %c0_i32_0 = arith.constant 0 : i32
    %c0_i32_1 = arith.constant 0 : i32
    return %c0_i32, %c0_i32_0 : i32, i32
  }
  func.func @transform_2(%arg0: i32) -> (i32, i32) {
    %c0_i32 = arith.constant 0 : i32
    %c0_i32_0 = arith.constant 0 : i32
    %c0_i32_1 = arith.constant 0 : i32
    return %c0_i32, %c0_i32_0 : i32, i32
  }
  func.func @transform_3(%arg0: i32) -> (i32, i32) {
    %c0_i32 = arith.constant 0 : i32
    %c0_i32_0 = arith.constant 0 : i32
    %c0_i32_1 = arith.constant 0 : i32
    return %c0_i32, %c0_i32_0 : i32, i32
  }
  func.func @transform_4(%arg0: i32) -> (i32, i32) {
    %c0_i32 = arith.constant 0 : i32
    %c0_i32_0 = arith.constant 0 : i32
    %c0_i32_1 = arith.constant 0 : i32
    return %c0_i32, %c0_i32_0 : i32, i32
  }
  func.func @transform_5(%arg0: i32) -> (i32, i32) {
    %c0_i32 = arith.constant 0 : i32
    %c0_i32_0 = arith.constant 0 : i32
    %c0_i32_1 = arith.constant 0 : i32
    return %c0_i32, %c0_i32_0 : i32, i32
  }
  func.func @transform_6(%arg0: i32) -> (i32, i32, i32) {
    %c0_i32 = arith.constant 0 : i32
    %c0_i32_0 = arith.constant 0 : i32
    %c0_i32_1 = arith.constant 0 : i32
    return %arg0, %c0_i32, %c0_i32_0 : i32, i32, i32
  }
}

</mosaic_0001>

<bundles_post_ra>
// kernel: basic_block.1
= control target key start
LH: loop header
LB: loop body
LE: loop exit
PB: predicated region body
PF: predicated region fallthrough
CT: control target
= control target key end

     0   :  { %s788_s21 = smov 0   ;;  %s897_s0 = inlined_call_operand.vmem [shape: f32[2,8,256], index: 0, kind: input, shape index: {}]   ;;  %s898_s1 = inlined_call_operand.vmem [shape: f32[4,8], index: 1, kind: input, shape index: {}]   ;;  %s899_s2 = inlined_call_operand.vmem [shape: f32[4,1], index: 2, kind: input, shape index: {}]   ;;  %s900_s3 = inlined_call_operand.vmem [shape: f32[8,36], index: 3, kind: input, shape index: {}]   ;;  %s901_s4 = inlined_call_operand.vmem [shape: f32[8,1], index: 4, kind: input, shape index: {}]   ;;  %s902_s5 = inlined_call_operand.vmem [shape: f32[9,256], index: 5, kind: input, shape index: {}]   ;;  %s903_s6 = inlined_call_operand.vmem [shape: f32[2,8,256], index: 6, kind: output, shape index: {}]  }
   0x1 LB: > { %s688_s22 = sadd.s32 4294967295, %s741_s21   ;;  %p692_p0 = scmp.ge.s32.totalorder %s741_s21, 1  ;;  %s741_s21 = sphi %s788_s21, %s16_s21  }
   0x2   : > { %p212_p1 = scmp.lt.s32.totalorder %s741_s21, 3 }
   0x4   : > { %p213_p2 = pnand %p692_p0, %p212_p1 }
   0x5   : > { %p242_p3 = scmp.lt.s32.totalorder (!%p213_p2), %s688_s22, 1  ;;  %v743_v0 = vmov (!%p213_p2), 0.0   ;;  %v744_v1 = vmov (!%p213_p2), 0   ;;  %v255_v2 = vld [vmem:[%s899_s2] sm:$0xf] (!%p213_p2)  ;;  %vm261_vm0 = vcmask (!%p213_p2), 64512   ;;  %v348_v16 = vlaneseq (!%p213_p2) }
   0x6   : > { %216 = sbr.rel (%p213_p2) target bundleno = 617 (0x269), region = 44  ;;  %329 = vmatprep.mubr.f32.mxu0 (!%p213_p2), %v743_v0  ;;  %733 = vset.pattern.permute.xlu0 (!%p213_p2), %v744_v1  ;;  %v252_v5 = vld [vmem:[%s898_s1] sm:$0xf] (!%p213_p2)  ;;  %s745_s7 = smov (!%p213_p2), 1   ;;  %v832_v21 = vld [vmem:[%s902_s5 + $0x8] sm:$0xff] (!%p213_p2)  ;;  %vm545_vm9 = vcmask (!%p213_p2), 1043456  }
   0x7   : > { %258 = vperm.xlu0 (!%p213_p2), %733, %v255_v2   ;;  %616 = vmatprep.mubr.f32.mxu1 (!%p213_p2), %v743_v0  ;;  %s746_s8 = smov (!%p213_p2), 16   ;;  %s747_s9 = smov (!%p213_p2), 17   ;;  %v535_v15 = vld [vmem:[%s901_s4] sm:$0xff] (!%p213_p2)  ;;  %v819_v17 = vshrl.u32 (!%p213_p2), %v348_v16, 7  ;;  %v821_v18 = vand.u32 (!%p213_p2), 127, %v348_v16  ;;  %vm541_vm10 = vcmask (!%p213_p2), 293888  }
   0x8   : > { %734 = vset.pattern.permute.xlu1 (!%p213_p2), %v744_v1  ;;  %s748_s10 = smov (!%p213_p2), 15   ;;  %s749_s11 = smov (!%p213_p2), 127   ;;  %v827_v20 = vld [vmem:[%s902_s5] sm:$0xff] (!%p213_p2) }
   0x9   : > { %s750_s12 = smov (!%p213_p2), 112   ;;  %s751_s13 = smov (!%p213_p2), 113   ;;  %v418_v19 = vsub.s32 (!%p213_p2), 3, %v819_v17  ;;  %vm413_vm1 = vcmp.lt.s32.totalorder (!%p213_p2), %v821_v18, 1  ;;  %v355_v26 = vsub.s32 (!%p213_p2), 0, %v819_v17  ;;  %vm350_vm2 = vcmp.lt.s32.totalorder (!%p213_p2), %v821_v18, 17 }
   0xa   : > { %s752_s14 = smov (!%p213_p2), 111   ;;  %v399_v31 = vsub.s32 (!%p213_p2), 2, %v819_v17  ;;  %v374_v40 = vsub.s32 (!%p213_p2), 1, %v819_v17  ;;  %vm394_vm3 = vcmp.lt.s32.totalorder (!%p213_p2), %v821_v18, 15  ;;  %v445_v47 = vsub.s32 (!%p213_p2), 5, %v819_v17 }
   0xb   : > { %v419_v24 = vrot.slane (!%p213_p2), %v827_v20, %v418_v19  ;;  %v423_v25 = vrot.slane (!%p213_p2), %v832_v21, %v418_v19  ;;  %v356_v34 = vrot.slane (!%p213_p2), %v827_v20, %v355_v26  ;;  %v360_v35 = vrot.slane (!%p213_p2), %v832_v21, %v355_v26 }
   0xc   : > { %v400_v43 = vrot.slane (!%p213_p2), %v827_v20, %v399_v31  ;;  %v404_v46 = vrot.slane (!%p213_p2), %v832_v21, %v399_v31  ;;  %vm369_vm4 = vcmp.lt.s32.totalorder (!%p213_p2), %v821_v18, 16  ;;  %v375_v50 = vrot.slane (!%p213_p2), %v827_v20, %v374_v40 }
   0xd   : > { %s905_s22 = smov (!%p242_p3, %s688_s22), 1  ;;  %v489_v51 = vsub.s32 7, %v819_v17  ;;  %v379_v54 = vrot.slane %v832_v21, %v374_v40  ;;  %vm440_vm5 = vcmp.lt.s32.totalorder %v821_v18, 127  ;;  %v446_v57 = vrot.slane %v827_v20, %v445_v47 }
   0xe   : > { %s705_s25 = sshll.u32 %s905_s22, 4  ;;  %v450_v58 = vrot.slane %v832_v21, %v445_v47  ;;  %vm484_vm6 = vcmp.lt.s32.totalorder %v821_v18, 112  ;;  %v470_v63 = vsub.s32 6, %v819_v17  ;;  %vm465_vm7 = vcmp.lt.s32.totalorder %v821_v18, 113 }
   0xf   : > { %s246_s28 = scalar_lea.vmem %s897_s0, %s705_s25  ;;  %v490_v61 = vrot.slane %v827_v20, %v489_v51  ;;  %v494_v62 = vrot.slane %v832_v21, %v489_v51  ;;  %vm509_vm8 = vcmp.lt.s32.totalorder %v821_v18, 111  ;;  %v524_v51 = vld [vmem:[%s900_s3] sm:$0xff] }
  0x10   : > { %v807_v3 = vld [vmem:[%s246_s28 + $0x8] sm:$0xff]  ;;  %v809_v4 = vld [vmem:[%s246_s28] sm:$0xff] }
  0x11   : > { %265 = vmatprep.subr.mxu0 %v807_v3 }
  0x12   : > { %266 = vmatpush1.msra.mxu0 %v809_v4 }
  0x13   : > { %697 = vmatmul.mubr.msk.f32.vlgmr.msra.gmra.mrb[0].mxu0 %vm261_vm0, %v252_v5 }
  0x86   : > { %v259_v6 = vpop.permute.xlu0 %258 }
  0xe6   : > { %v331_v7 = vpop.f32.mrb[0].mxu0 }
  0xe7   : > { %v332_v8 = vadd.f32 %v331_v7, %v259_v6  ;;  %v333_v9 = vpop.f32.mrb[1].mxu0 }
  0xe8   : > { %v334_v10 = vadd.f32 %v333_v9, %v259_v6 }
  0xe9   : > { %v336_v11 = vmul.f32 0.1, %v332_v8 }
  0xea   : > { %v337_v12 = vmul.f32 0.1, %v334_v10 }
  0xeb   : > { %v338_v13 = vmax.f32 %v332_v8, %v336_v11 }
  0xec   : > { %v339_v14 = vmax.f32 %v334_v10, %v337_v12 }
  0xed   : > { %434 = vst [vmem:[#allocation2 + $0x20] sm:$0xf] %v338_v13  ;;  %409 = vrot.lane.b32.xlu1 %v338_v13, %s745_s7  ;;  %365 = vrot.lane.b32.xlu0 %v338_v13, %s746_s8 }
  0xee   : > { %435 = vst [vmem:[#allocation2 + $0x28] sm:$0xf] %v339_v14 }
  0xf1   : > { %344 = vrot.lane.b32.xlu1 %v338_v13, %s747_s9  ;;  %411 = vrot.lane.b32.xlu0 %v339_v14, %s745_s7 }
  0xf5   : > { %390 = vrot.lane.b32.xlu1 %v338_v13, %s748_s10  ;;  %346 = vrot.lane.b32.xlu0 %v339_v14, %s747_s9 }
  0xf9   : > { %436 = vrot.lane.b32.xlu1 %v338_v13, %s749_s11  ;;  %392 = vrot.lane.b32.xlu0 %v339_v14, %s748_s10 }
  0xfd   : > { %367 = vrot.lane.b32.xlu1 %v339_v14, %s746_s8  ;;  %438 = vrot.lane.b32.xlu0 %v339_v14, %s749_s11  ;;  %s251_s8 = scalar_lea.vmem %s903_s6, %s705_s25 }
 0x101   : > { %480 = vrot.lane.b32.xlu1 %v338_v13, %s750_s12  ;;  %482 = vrot.lane.b32.xlu0 %v339_v14, %s750_s12 }
 0x105   : > { %461 = vrot.lane.b32.xlu1 %v338_v13, %s751_s13  ;;  %463 = vrot.lane.b32.xlu0 %v339_v14, %s751_s13 }
 0x109   : > { %505 = vrot.lane.b32.xlu1 %v338_v13, %s752_s14  ;;  %507 = vrot.lane.b32.xlu0 %v339_v14, %s752_s14 }
 0x10d   : > { %538 = vperm.xlu1 %734, %v535_v15  }
 0x15f   : > { %v410_v22 = vpop.permute.xlu1 %409  ;;  %v366_v23 = vpop.permute.xlu0 %365 }
 0x163   : > { %v345_v27 = vpop.permute.xlu1 %344  ;;  %v412_v28 = vpop.permute.xlu0 %411 }
 0x164   : > { %v414_v29 = vsel %vm413_vm1, %v410_v22, %v412_v28  ;;  %v415_v30 = vsel %vm413_vm1, %v412_v28, %v410_v22 }
 0x165   : > { %v424_v32 = vmul.f32 %v419_v24, %v415_v30  ;;  %v425_v33 = vmul.f32 %v423_v25, %v414_v29  ;;  %v475_v24 = vrot.slane %v832_v21, %v470_v63 }
 0x167   : > { %v428_v36 = vrot.slane %v424_v32, 4  ;;  %v429_v37 = vrot.slane %v425_v33, 4  ;;  %v391_v38 = vpop.permute.xlu1 %390  ;;  %v347_v39 = vpop.permute.xlu0 %346  ;;  %v698_v33 = vld [vmem:[%s902_s5 + $0x10] ss:$0 sm:$0xff] }
 0x168   : > { %v351_v41 = vsel %vm350_vm2, %v345_v27, %v347_v39  ;;  %v352_v42 = vsel %vm350_vm2, %v347_v39, %v345_v27 }
 0x169   : > { %432 = vst [vmem:[#allocation2 + $0x10] sm:$0xf0] %v428_v36  ;;  %433 = vst [vmem:[#allocation2 + $0x18] sm:$0xf0] %v429_v37  ;;  %v361_v44 = vmul.f32 %v356_v34, %v352_v42  ;;  %v362_v45 = vmul.f32 %v360_v35, %v351_v41 }
 0x16b   : > { %363 = vst [vmem:[#allocation2] sm:$0xf] %v361_v44  ;;  %364 = vst [vmem:[#allocation2 + $0x8] sm:$0xf] %v362_v45  ;;  %v437_v48 = vpop.permute.xlu1 %436  ;;  %v393_v49 = vpop.permute.xlu0 %392 }
 0x16c   : > { %v395_v52 = vsel %vm394_vm3, %v391_v38, %v393_v49  ;;  %v396_v53 = vsel %vm394_vm3, %v393_v49, %v391_v38 }
 0x16d   : > { %v405_v55 = vmul.f32 %v400_v43, %v396_v53  ;;  %v406_v56 = vmul.f32 %v404_v46, %v395_v52 }
 0x16f   : > { %407 = vst [vmem:[#allocation2 + $0x10] sm:$0xf] %v405_v55  ;;  %408 = vst [vmem:[#allocation2 + $0x18] sm:$0xf] %v406_v56  ;;  %v368_v59 = vpop.permute.xlu1 %367  ;;  %v439_v60 = vpop.permute.xlu0 %438 }
 0x170   : > { %v370_v0 = vsel %vm369_vm4, %v366_v23, %v368_v59  ;;  %v371_v1 = vsel %vm369_vm4, %v368_v59, %v366_v23  ;;  %v441_v2 = vsel %vm440_vm5, %v437_v48, %v439_v60  ;;  %v442_v5 = vsel %vm440_vm5, %v439_v60, %v437_v48 }
 0x171   : > { %v380_v6 = vmul.f32 %v375_v50, %v371_v1  ;;  %v381_v7 = vmul.f32 %v379_v54, %v370_v0  ;;  %v451_v8 = vmul.f32 %v446_v57, %v441_v2  ;;  %v452_v9 = vmul.f32 %v450_v58, %v442_v5 }
 0x172   : > { %v471_v23 = vrot.slane %v827_v20, %v470_v63  ;;  %v699_v20 = vld [vmem:[%s902_s5 + $0x18] ss:$0 sm:$0xff] }
 0x173   : > { %v384_v10 = vrot.slane %v380_v6, 4  ;;  %v385_v11 = vrot.slane %v381_v7, 4  ;;  %v455_v12 = vrot.slane %v451_v8, 4  ;;  %v456_v13 = vrot.slane %v452_v9, 4  ;;  %v481_v14 = vpop.permute.xlu1 %480  ;;  %v483_v15 = vpop.permute.xlu0 %482 }
 0x174   : > { %v485_v16 = vsel %vm484_vm6, %v481_v14, %v483_v15  ;;  %v486_v17 = vsel %vm484_vm6, %v483_v15, %v481_v14 }
 0x175   : > { %388 = vst [vmem:[#allocation2] sm:$0xf0] %v384_v10  ;;  %389 = vst [vmem:[#allocation2 + $0x8] sm:$0xf0] %v385_v11  ;;  %v495_v19 = vmul.f32 %v490_v61, %v485_v16  ;;  %v496_v22 = vmul.f32 %v494_v62, %v486_v17 }
 0x176   : > { %459 = vst [vmem:[#allocation2 + $0x20] sm:$0xf0] %v455_v12  ;;  %460 = vst [vmem:[#allocation2 + $0x28] sm:$0xf0] %v456_v13  ;;  %v528_v35 = vld [vmem:[#allocation2 + $0x18] sm:$0xff]  ;;  %v527_v40 = vld [vmem:[#allocation2 + $0x10] sm:$0xff] }
 0x177   : > { %v499_v25 = vrot.slane %v495_v19, 4  ;;  %v500_v26 = vrot.slane %v496_v22, 4  ;;  %v462_v27 = vpop.permute.xlu1 %461  ;;  %v464_v28 = vpop.permute.xlu0 %463 }
 0x178   : > { %v466_v29 = vsel %vm465_vm7, %v462_v27, %v464_v28  ;;  %v467_v30 = vsel %vm465_vm7, %v464_v28, %v462_v27 }
 0x179   : > { %503 = vst [vmem:[#allocation2 + $0x30] sm:$0xf0] %v499_v25  ;;  %504 = vst [vmem:[#allocation2 + $0x38] sm:$0xf0] %v500_v26  ;;  %v476_v31 = vmul.f32 %v471_v23, %v466_v29  ;;  %v477_v32 = vmul.f32 %v475_v24, %v467_v30 }
 0x17b   : > { %478 = vst [vmem:[#allocation2 + $0x30] sm:$0xf] %v476_v31  ;;  %479 = vst [vmem:[#allocation2 + $0x38] sm:$0xf] %v477_v32  ;;  %v506_v21 = vpop.permute.xlu1 %505  ;;  %v508_v34 = vpop.permute.xlu0 %507 }
 0x17c   : > { %v510_v36 = vsel %vm509_vm8, %v506_v21, %v508_v34  ;;  %v511_v37 = vsel %vm509_vm8, %v508_v34, %v506_v21  ;;  %v526_v38 = vld [vmem:[#allocation2 + $0x8] sm:$0xff]  ;;  %v525_v39 = vld [vmem:[#allocation2] sm:$0xff] }
 0x17d   : > { %v520_v41 = vmul.f32 %v698_v33, %v510_v36  ;;  %v521_v18 = vmul.f32 %v699_v20, %v511_v37  ;;  %v707_v42 = vpack.c.bf16 %v528_v35, %v526_v38  ;;  %v709_v43 = vpack.c.bf16 %v527_v40, %v525_v39  ;;  %v530_v44 = vld [vmem:[#allocation2 + $0x28] sm:$0xff]  ;;  %v529_v46 = vld [vmem:[#allocation2 + $0x20] sm:$0xff] }
 0x17f   : > { %522 = vst [vmem:[#allocation2 + $0x40] sm:$0xf] %v520_v41  ;;  %523 = vst [vmem:[#allocation2 + $0x48] sm:$0xf] %v521_v18  ;;  %708 = vmatprep.subr.bf16.mxu1 %v707_v42 }
 0x180   : > { %710 = vmatpush1.bf16.msra.mxu1 %v709_v43 }
 0x182   : > { %v532_v45 = vld [vmem:[#allocation2 + $0x38] sm:$0xff]  ;;  %v531_v47 = vld [vmem:[#allocation2 + $0x30] sm:$0xff] }
 0x183   : > { %v711_v48 = vpack.c.bf16 %v532_v45, %v530_v44  ;;  %v713_v49 = vpack.c.bf16 %v531_v47, %v529_v46 }
 0x185   : > { %712 = vmatprep.subr.bf16.mxu1 %v711_v48 }
 0x186   : > { %714 = vmatpush1.bf16.msra.mxu1 %v713_v49  ;;  %v534_v50 = vld [vmem:[#allocation2 + $0x48] sm:$0xf]  ;;  %v533_v52 = vld [vmem:[#allocation2 + $0x40] sm:$0xf] }
 0x187   : > { %700 = vmatprep.subr.msk.mxu1 %vm545_vm9, %v534_v50 }
 0x18a   : > { %701 = vmatpush1.msk.msra.mxu1 %vm545_vm9, %v533_v52 }
 0x18b   : > { %702 = vmatmul.mubr.msk.f32.vlgmr.msra.gmra.mrb[0].mxu1 %vm541_vm10, %v524_v51 }
 0x18c   : > { %v539_v53 = vpop.permute.xlu1 %538 }
 0x25e   : > { %v618_v54 = vpop.f32.mrb[0].mxu1 }
 0x25f   : > { %v619_v55 = vadd.f32 %v618_v54, %v539_v53  ;;  %v620_v56 = vpop.f32.mrb[1].mxu1 }
 0x260   : > { %v621_v57 = vadd.f32 %v620_v56, %v539_v53 }
 0x261   : > { %v623_v58 = vmul.f32 0.1, %v619_v55 }
 0x262   : > { %v624_v59 = vmul.f32 0.1, %v621_v57 }
 0x263   : > { %v625_v60 = vmax.f32 %v619_v55, %v623_v58 }
 0x264   : > { %v626_v61 = vmax.f32 %v621_v57, %v624_v59 }
 0x265   : > { %v629_v62 = vadd.f32 %v625_v60, %v809_v4 }
 0x266   : > { %v630_v63 = vadd.f32 %v626_v61, %v807_v3 }
 0x267   : > { %631 = vst [vmem:[%s251_s8] sm:$0xff] %v629_v62 }
 0x268   : > { %632 = vst [vmem:[%s251_s8 + $0x8] sm:$0xff] %v630_v63 }
 0x269 PF: > { %s16_s21 = sadd.s32 1, %s741_s21  }
 0x26a   : > { %p13_p4 = scmp.ge.s32.totalorder %s16_s21, 4  }
 0x26c   :  { %15 = sbr.rel (!%p13_p4) target bundleno = 1 (0x1), region = 74 }

</bundles_post_ra>
